<compile_context>
chip_gen: v6e
topology: v6e:2x2x1
jax: 0.10.0
libtpu: 0.0.40
codegen_flags: <defaults>
</compile_context>

<pallas_src>
import functools

import jax
import jax.numpy as jnp
from jax import lax
from jax.experimental import pallas as pl
from jax.experimental.pallas import tpu as pltpu


def _conv1d_block_kernel(x_ref, w_ref, p_ref, p1_ref, p2_ref, selT_ref, sel_ref,
                         o_ref, *, M, TB, K, Cin_p, n_groups, eps, inv_n,
                         activation):
    # x_ref    : (Hp*TB, Cin_p)    bf16, rows ordered (h, b) with b fastest
    # w_ref    : (K*Cin_p, Cout_p) bf16 im2col weight (tap-major)
    # p_ref    : (8, Cout_p)       f32: row0=bias, row1=gamma, row2=beta
    # p1_ref   : (Cout_p, G_p)     f32 0/1 channel->group membership
    # p2_ref   : (G_p, Cout_p)     f32 0/1 group->channel broadcast
    # selT_ref : (TB, M)           f32 0/1 per-sample row selector (transposed)
    # sel_ref  : (M, TB)           f32 0/1 per-sample row selector
    # o_ref    : (M, Cout_p)       output tile (lane-dense)

    # ---- Conv1d: K accumulating MXU matmuls, batch folded into M ----
    acc = jnp.dot(x_ref[0:M, :], w_ref[0:Cin_p, :],
                  preferred_element_type=jnp.float32)
    for k in range(1, K):
        acc = acc + jnp.dot(x_ref[k * TB:k * TB + M, :],
                            w_ref[k * Cin_p:(k + 1) * Cin_p, :],
                            preferred_element_type=jnp.float32)
    y = acc + p_ref[0:1, :]                                    # + bias, f32

    # ---- GroupNorm (per sample, per group over horizon x channels) ----
    if n_groups is not None:
        selT = selT_ref[...]
        # Per-sample per-channel sums over the horizon.  Rows of one sample are
        # strided by TB, so use a 0/1 selector matmul instead of a reshape.
        s_bc = jnp.dot(selT, y, preferred_element_type=jnp.float32)      # (TB, Cout_p)
        q_bc = jnp.dot(selT, y * y, preferred_element_type=jnp.float32)  # (TB, Cout_p)
        # Channels -> groups via the skinny projection.
        mean_g = jnp.dot(s_bc, p1_ref[...],
                         preferred_element_type=jnp.float32) * inv_n     # (TB, G_p)
        msq_g = jnp.dot(q_bc, p1_ref[...],
                        preferred_element_type=jnp.float32) * inv_n
        # Clamp: E[x^2] - mean^2 can cancel slightly negative in f32.
        var_g = jnp.maximum(msq_g - mean_g * mean_g, 0.0)
        rstd_g = lax.rsqrt(var_g + eps)                                  # (TB, G_p)
        # Groups -> channels, fold in the affine params.
        rstd_c = jnp.dot(rstd_g, p2_ref[...], preferred_element_type=jnp.float32)
        mean_c = jnp.dot(mean_g, p2_ref[...], preferred_element_type=jnp.float32)
        scale_c = rstd_c * p_ref[1:2, :]                                 # (TB, Cout_p)
        shift_c = p_ref[2:3, :] - mean_c * scale_c
        # Broadcast per-sample scale/shift back onto the (h, b) rows via the MXU.
        sel = sel_ref[...]
        y = (y * jnp.dot(sel, scale_c, preferred_element_type=jnp.float32)
             + jnp.dot(sel, shift_c, preferred_element_type=jnp.float32))

    # ---- Activation ----
    if activation == "Mish":
        # Single-exp Mish: tanh(softplus(x)) = ((1+e^x)^2 - 1)/((1+e^x)^2 + 1),
        # clamped where it saturates.  approx reciprocal runs on the EUP and has
        # ~2^-12 rel error (fine for inference-grade parity).
        t = jnp.exp(jnp.minimum(y, 20.0))
        u = (1.0 + t) * (1.0 + t)
        tanh_sp = (u - 1.0) * pl.reciprocal(u + 1.0, approx=True)
        tanh_sp = jnp.where(y > 20.0, 1.0, tanh_sp)
        o_ref[...] = (y * tanh_sp).astype(o_ref.dtype)
    elif activation == "ReLU":
        o_ref[...] = jnp.maximum(y, 0.0).astype(o_ref.dtype)
    else:
        raise ValueError("Unknown activation type for Conv1dBlock")


def conv1d_block(x, weight, bias, gamma=None, beta=None, *, n_groups,
                 eps=1e-5, activation_type="Mish", out_dtype=None):
    """x: (B, Cin, H). weight: (Cout, Cin, K). Returns (B, Cout, H_out) in NCW.

    out_dtype defaults to x.dtype; pass jnp.bfloat16 to halve HBM writeback when
    the surrounding model runs bf16 activations.
    """
    B, Cin, H = x.shape
    Cout, _, K = weight.shape
    pad = K // 2
    Hp = H + 2 * pad
    H_out = Hp - (K - 1)                 # == H for odd K (PyTorch padding=K//2)
    out_dtype = x.dtype if out_dtype is None else out_dtype

    LANE = 128
    Cin_p = -(-Cin // LANE) * LANE
    Cout_p = -(-Cout // LANE) * LANE
    G_p = LANE if n_groups is None else -(-n_groups // LANE) * LANE
    if n_groups is not None:
        assert Cout % n_groups == 0, "GroupNorm requires Cout % n_groups == 0"

    # ---- batch-tile size: fold batch into the matmul M dim, bounded by VMEM ----
    try:
        vmem_phys = int(pltpu.get_tpu_info().vmem_capacity_bytes)
    except Exception:
        vmem_phys = 64 << 20                          # v7x physical floor
    out_isize = jnp.dtype(out_dtype).itemsize

    def _vmem_est(tb_):
        m = H_out * tb_
        x_blk = Hp * tb_ * Cin_p * 2                  # bf16 input block
        o_blk = m * Cout_p * out_isize
        w_blk = K * Cin_p * Cout_p * 2
        gn_blk = (8 * Cout_p + 2 * Cout_p * G_p + m * LANE + 8 * m) * 4
        live = 4 * m * Cout_p * 4                     # f32 accumulator + temps
        return 2 * (x_blk + o_blk + w_blk + gn_blk) + live  # x2: double buffering

    tb = max(1, min(B, -(-512 // H_out)))             # target M = H_out*TB ~ 512
    if tb > 8:
        tb = (tb // 8) * 8                            # sublane-friendly tile
    while tb > 1 and _vmem_est(tb) > int(vmem_phys * 0.55):
        tb = max(1, tb // 2)
    # TODO(synk): for very long horizons add an H-tile grid axis with running
    # GroupNorm sum/sum-of-squares (init/finalize via pl.when), plus a
    # group-aligned Cout tile axis so v7x's 2 TensorCores stay busy at B == 1.
    nbt = -(-B // tb)
    B_p = nbt * tb
    M = H_out * tb

    # ---- operand packing (one-time XLA glue; vanishes for NWC/bf16 callers) ----
    x_nwc = jnp.transpose(x, (0, 2, 1))                                  # (B, H, Cin)
    x_p = jnp.pad(x_nwc, ((0, B_p - B), (pad, pad), (0, Cin_p - Cin)))   # (B_p, Hp, Cin_p)
    x_p = x_p.reshape(nbt, tb, Hp, Cin_p).transpose(0, 2, 1, 3)          # (nbt, Hp, tb, Cin_p)
    x_tiles = x_p.reshape(nbt, Hp * tb, Cin_p).astype(jnp.bfloat16)      # rows = (h, b)

    w = jnp.transpose(weight, (2, 1, 0))                                 # (K, Cin, Cout)
    w = jnp.pad(w, ((0, 0), (0, Cin_p - Cin), (0, Cout_p - Cout)))
    w_col = w.reshape(K * Cin_p, Cout_p).astype(jnp.bfloat16)

    params = jnp.zeros((8, Cout_p), jnp.float32)
    params = params.at[0, :Cout].set(bias.astype(jnp.float32))

    if n_groups is not None:
        params = params.at[1, :Cout].set(gamma.astype(jnp.float32))
        params = params.at[2, :Cout].set(beta.astype(jnp.float32))
        cpg = Cout // n_groups
        ch = jnp.arange(Cout_p)
        grp = jnp.arange(G_p)
        memb = (((ch[:, None] // cpg) == grp[None, :])
                & (ch[:, None] < Cout) & (grp[None, :] < n_groups))
        p1 = memb.astype(jnp.float32)                                    # (Cout_p, G_p)
        p2 = jnp.transpose(p1)                                           # (G_p, Cout_p)
        row_b = jnp.arange(M) % tb
        sel = (row_b[:, None] == jnp.arange(tb)[None, :]).astype(jnp.float32)  # (M, tb)
        selT = jnp.transpose(sel)                                        # (tb, M)
        inv_n = 1.0 / float(H_out * cpg)
    else:
        p1 = jnp.zeros((8, LANE), jnp.float32)     # unused dummies
        p2 = jnp.zeros((8, LANE), jnp.float32)
        sel = jnp.zeros((8, LANE), jnp.float32)
        selT = jnp.zeros((8, LANE), jnp.float32)
        inv_n = 1.0

    kernel = functools.partial(
        _conv1d_block_kernel, M=M, TB=tb, K=K, Cin_p=Cin_p,
        n_groups=n_groups, eps=float(eps), inv_n=inv_n,
        activation=activation_type)

    est = _vmem_est(tb)
    vmem_limit = int(min(vmem_phys, int(est * 1.5))) if est > (24 << 20) else None

    # NOTE: weight / params / projections have constant index maps, so they are
    # DMA'd only once.  TODO(synk): mark them pipeline_mode=pl.Buffered(1) to
    # also drop the second (unused) VMEM buffer once single-buffering is
    # available on all target jax versions.
    out_tiles = pl.pallas_call(
        kernel,
        out_shape=jax.ShapeDtypeStruct((nbt, M, Cout_p), out_dtype),
        grid_spec=pltpu.PrefetchScalarGridSpec(
            num_scalar_prefetch=0,
            grid=(nbt,),
            in_specs=[
                pl.BlockSpec((None, Hp * tb, Cin_p), lambda bt: (bt, 0, 0)),
                pl.BlockSpec((K * Cin_p, Cout_p), lambda bt: (0, 0)),
                pl.BlockSpec((8, Cout_p), lambda bt: (0, 0)),
                pl.BlockSpec(p1.shape, lambda bt: (0, 0)),
                pl.BlockSpec(p2.shape, lambda bt: (0, 0)),
                pl.BlockSpec(selT.shape, lambda bt: (0, 0)),
                pl.BlockSpec(sel.shape, lambda bt: (0, 0)),
            ],
            out_specs=pl.BlockSpec((None, M, Cout_p), lambda bt: (bt, 0, 0)),
        ),
        compiler_params=pltpu.CompilerParams(
            dimension_semantics=("parallel",),
            vmem_limit_bytes=vmem_limit),
    )(x_tiles, w_col, params, p1, p2, selT, sel)

    # (nbt, H_out, tb, Cout_p) -> (B, Cout, H_out), NCW like the PyTorch module.
    out = out_tiles.reshape(nbt, H_out, tb, Cout_p)
    out = jnp.transpose(out, (0, 2, 3, 1)).reshape(B_p, Cout_p, H_out)
    return out[:B, :Cout, :]


def _reference(x, weight, bias, gamma, beta, *, n_groups, eps=1e-5):
    """Plain-JAX reference (conv inputs in bf16 to mirror the kernel's MXU dtype)."""
    K = weight.shape[-1]
    y = lax.conv_general_dilated(
        x.astype(jnp.bfloat16), weight.astype(jnp.bfloat16),
        window_strides=(1,), padding=[(K // 2, K // 2)],
        dimension_numbers=("NCH", "OIH", "NCH"),
        preferred_element_type=jnp.float32)
    y = y + bias[None, :, None]
    if n_groups is not None:
        B, C, Hh = y.shape
        yg = y.reshape(B, n_groups, C // n_groups, Hh)
        mean = jnp.mean(yg, axis=(2, 3), keepdims=True)
        var = jnp.var(yg, axis=(2, 3), keepdims=True)
        yn = ((yg - mean) / jnp.sqrt(var + eps)).reshape(B, C, Hh)
        y = yn * gamma[None, :, None] + beta[None, :, None]
    return y * jnp.tanh(jax.nn.softplus(y))


if __name__ == "__main__":
    B, Cin, Cout, H, K = 2, 4, 8, 16, 3
    n_groups = 2
    eps = 1e-5

    key = jax.random.PRNGKey(0)
    kx, kw, kb, kg, kbe = jax.random.split(key, 5)
    x = jax.random.normal(kx, (B, Cin, H), dtype=jnp.float32)
    bound = 1.0 / (Cin * K) ** 0.5
    weight = jax.random.uniform(kw, (Cout, Cin, K), jnp.float32, -bound, bound)
    bias = jax.random.uniform(kb, (Cout,), jnp.float32, -bound, bound)
    gamma = 1.0 + 0.1 * jax.random.normal(kg, (Cout,), dtype=jnp.float32)
    beta = 0.1 * jax.random.normal(kbe, (Cout,), dtype=jnp.float32)

    out = conv1d_block(x, weight, bias, gamma, beta, n_groups=n_groups, eps=eps)
    out = jax.block_until_ready(out)

    ref = _reference(x, weight, bias, gamma, beta, n_groups=n_groups, eps=eps)
    assert out.shape == (B, Cout, H), out.shape
    assert jnp.allclose(out, ref, atol=1e-2, rtol=1e-2), \
        float(jnp.max(jnp.abs(out - ref)))

    print("KERNEL_OK")
</pallas_src>

<mosaic_0001>
module attributes {stable_mosaic.version = 11 : i64} {
  func.func @_conv1d_block_kernel(%arg0: i32, %arg1: memref<1x36x128xbf16, #tpu.memory_space<vmem>>, %arg2: memref<384x128xbf16, #tpu.memory_space<vmem>>, %arg3: memref<8x128xf32, #tpu.memory_space<vmem>>, %arg4: memref<128x128xf32, #tpu.memory_space<vmem>>, %arg5: memref<128x128xf32, #tpu.memory_space<vmem>>, %arg6: memref<2x32xf32, #tpu.memory_space<vmem>>, %arg7: memref<32x2xf32, #tpu.memory_space<vmem>>, %arg8: memref<1x32x128xf32, #tpu.memory_space<vmem>>) attributes {dimension_semantics = [#tpu.dimension_semantics<parallel>], iteration_bounds = array<i64: 1>, scalar_prefetch = 0 : i64, scratch_operands = 0 : i64, tpu.core_type = #tpu.core_type<tc>, window_params = [{transform_indices = @transform_0, window_bounds = array<i64: 1, 36, 128>}, {pipeline_mode = #tpu.pipeline_mode<synchronous>, transform_indices = @transform_1, window_bounds = array<i64: 384, 128>}, {pipeline_mode = #tpu.pipeline_mode<synchronous>, transform_indices = @transform_2, window_bounds = array<i64: 8, 128>}, {pipeline_mode = #tpu.pipeline_mode<synchronous>, transform_indices = @transform_3, window_bounds = array<i64: 128, 128>}, {pipeline_mode = #tpu.pipeline_mode<synchronous>, transform_indices = @transform_4, window_bounds = array<i64: 128, 128>}, {pipeline_mode = #tpu.pipeline_mode<synchronous>, transform_indices = @transform_5, window_bounds = array<i64: 2, 32>}, {pipeline_mode = #tpu.pipeline_mode<synchronous>, transform_indices = @transform_6, window_bounds = array<i64: 32, 2>}, {transform_indices = @transform_7, window_bounds = array<i64: 1, 32, 128>}]} {
    %c0 = arith.constant 0 : index
    %c0_0 = arith.constant 0 : index
    %c0_1 = arith.constant 0 : index
    %0 = vector.load %arg1[%c0, %c0_0, %c0_1] : memref<1x36x128xbf16, #tpu.memory_space<vmem>>, vector<1x32x128xbf16>
    %1 = vector.shape_cast %0 : vector<1x32x128xbf16> to vector<32x128xbf16>
    %c0_2 = arith.constant 0 : index
    %c0_3 = arith.constant 0 : index
    %2 = vector.load %arg2[%c0_2, %c0_3] : memref<384x128xbf16, #tpu.memory_space<vmem>>, vector<128x128xbf16>
    %cst = arith.constant dense<0.000000e+00> : vector<32x128xf32>
    %3 = tpu.matmul %1, %2, %cst {dimension_numbers = #tpu.dot_dimension_numbers<[1], [0], [0], [1], [0, 0, 1, 1], [], []>} : vector<32x128xbf16>, vector<128x128xbf16>, vector<32x128xf32> -> vector<32x128xf32>
    %c0_4 = arith.constant 0 : index
    %c2 = arith.constant 2 : index
    %c0_5 = arith.constant 0 : index
    %4 = vector.load %arg1[%c0_4, %c2, %c0_5] : memref<1x36x128xbf16, #tpu.memory_space<vmem>>, vector<1x32x128xbf16>
    %5 = vector.shape_cast %4 : vector<1x32x128xbf16> to vector<32x128xbf16>
    %c128 = arith.constant 128 : index
    %c0_6 = arith.constant 0 : index
    %6 = vector.load %arg2[%c128, %c0_6] : memref<384x128xbf16, #tpu.memory_space<vmem>>, vector<128x128xbf16>
    %cst_7 = arith.constant dense<0.000000e+00> : vector<32x128xf32>
    %7 = tpu.matmul %5, %6, %cst_7 {dimension_numbers = #tpu.dot_dimension_numbers<[1], [0], [0], [1], [0, 0, 1, 1], [], []>} : vector<32x128xbf16>, vector<128x128xbf16>, vector<32x128xf32> -> vector<32x128xf32>
    %8 = arith.addf %3, %7 : vector<32x128xf32>
    %c0_8 = arith.constant 0 : index
    %c4 = arith.constant 4 : index
    %c0_9 = arith.constant 0 : index
    %9 = vector.load %arg1[%c0_8, %c4, %c0_9] : memref<1x36x128xbf16, #tpu.memory_space<vmem>>, vector<1x32x128xbf16>
    %10 = vector.shape_cast %9 : vector<1x32x128xbf16> to vector<32x128xbf16>
    %c256 = arith.constant 256 : index
    %c0_10 = arith.constant 0 : index
    %11 = vector.load %arg2[%c256, %c0_10] : memref<384x128xbf16, #tpu.memory_space<vmem>>, vector<128x128xbf16>
    %cst_11 = arith.constant dense<0.000000e+00> : vector<32x128xf32>
    %12 = tpu.matmul %10, %11, %cst_11 {dimension_numbers = #tpu.dot_dimension_numbers<[1], [0], [0], [1], [0, 0, 1, 1], [], []>} : vector<32x128xbf16>, vector<128x128xbf16>, vector<32x128xf32> -> vector<32x128xf32>
    %13 = arith.addf %8, %12 : vector<32x128xf32>
    %c0_12 = arith.constant 0 : index
    %c0_13 = arith.constant 0 : index
    %14 = vector.load %arg3[%c0_12, %c0_13] : memref<8x128xf32, #tpu.memory_space<vmem>>, vector<1x128xf32>
    %15 = vector.broadcast %14 : vector<1x128xf32> to vector<32x128xf32>
    %16 = arith.addf %13, %15 : vector<32x128xf32>
    %c0_14 = arith.constant 0 : index
    %c0_15 = arith.constant 0 : index
    %17 = vector.load %arg6[%c0_14, %c0_15] : memref<2x32xf32, #tpu.memory_space<vmem>>, vector<2x32xf32>
    %cst_16 = arith.constant dense<0.000000e+00> : vector<2x128xf32>
    %18 = tpu.matmul %17, %16, %cst_16 {dimension_numbers = #tpu.dot_dimension_numbers<[1], [0], [0], [1], [0, 0, 1, 1], [], []>} : vector<2x32xf32>, vector<32x128xf32>, vector<2x128xf32> -> vector<2x128xf32>
    %19 = arith.mulf %16, %16 : vector<32x128xf32>
    %cst_17 = arith.constant dense<0.000000e+00> : vector<2x128xf32>
    %20 = tpu.matmul %17, %19, %cst_17 {dimension_numbers = #tpu.dot_dimension_numbers<[1], [0], [0], [1], [0, 0, 1, 1], [], []>} : vector<2x32xf32>, vector<32x128xf32>, vector<2x128xf32> -> vector<2x128xf32>
    %c0_18 = arith.constant 0 : index
    %c0_19 = arith.constant 0 : index
    %21 = vector.load %arg4[%c0_18, %c0_19] : memref<128x128xf32, #tpu.memory_space<vmem>>, vector<128x128xf32>
    %cst_20 = arith.constant dense<0.000000e+00> : vector<2x128xf32>
    %22 = tpu.matmul %18, %21, %cst_20 {dimension_numbers = #tpu.dot_dimension_numbers<[1], [0], [0], [1], [0, 0, 1, 1], [], []>} : vector<2x128xf32>, vector<128x128xf32>, vector<2x128xf32> -> vector<2x128xf32>
    %cst_21 = arith.constant 1.562500e-02 : f32
    %23 = vector.broadcast %cst_21 : f32 to vector<2x128xf32>
    %24 = arith.mulf %22, %23 : vector<2x128xf32>
    %c0_22 = arith.constant 0 : index
    %c0_23 = arith.constant 0 : index
    %25 = vector.load %arg4[%c0_22, %c0_23] : memref<128x128xf32, #tpu.memory_space<vmem>>, vector<128x128xf32>
    %cst_24 = arith.constant dense<0.000000e+00> : vector<2x128xf32>
    %26 = tpu.matmul %20, %25, %cst_24 {dimension_numbers = #tpu.dot_dimension_numbers<[1], [0], [0], [1], [0, 0, 1, 1], [], []>} : vector<2x128xf32>, vector<128x128xf32>, vector<2x128xf32> -> vector<2x128xf32>
    %cst_25 = arith.constant 1.562500e-02 : f32
    %27 = vector.broadcast %cst_25 : f32 to vector<2x128xf32>
    %28 = arith.mulf %26, %27 : vector<2x128xf32>
    %29 = arith.mulf %24, %24 : vector<2x128xf32>
    %30 = arith.subf %28, %29 : vector<2x128xf32>
    %cst_26 = arith.constant 0.000000e+00 : f32
    %31 = vector.broadcast %cst_26 : f32 to vector<2x128xf32>
    %32 = arith.maximumf %30, %31 : vector<2x128xf32>
    %cst_27 = arith.constant 9.99999974E-6 : f32
    %33 = vector.broadcast %cst_27 : f32 to vector<2x128xf32>
    %34 = arith.addf %32, %33 : vector<2x128xf32>
    %35 = math.rsqrt %34 : vector<2x128xf32>
    %c0_28 = arith.constant 0 : index
    %c0_29 = arith.constant 0 : index
    %36 = vector.load %arg5[%c0_28, %c0_29] : memref<128x128xf32, #tpu.memory_space<vmem>>, vector<128x128xf32>
    %cst_30 = arith.constant dense<0.000000e+00> : vector<2x128xf32>
    %37 = tpu.matmul %35, %36, %cst_30 {dimension_numbers = #tpu.dot_dimension_numbers<[1], [0], [0], [1], [0, 0, 1, 1], [], []>} : vector<2x128xf32>, vector<128x128xf32>, vector<2x128xf32> -> vector<2x128xf32>
    %c0_31 = arith.constant 0 : index
    %c0_32 = arith.constant 0 : index
    %38 = vector.load %arg5[%c0_31, %c0_32] : memref<128x128xf32, #tpu.memory_space<vmem>>, vector<128x128xf32>
    %cst_33 = arith.constant dense<0.000000e+00> : vector<2x128xf32>
    %39 = tpu.matmul %24, %38, %cst_33 {dimension_numbers = #tpu.dot_dimension_numbers<[1], [0], [0], [1], [0, 0, 1, 1], [], []>} : vector<2x128xf32>, vector<128x128xf32>, vector<2x128xf32> -> vector<2x128xf32>
    %c1 = arith.constant 1 : index
    %c0_34 = arith.constant 0 : index
    %40 = vector.load %arg3[%c1, %c0_34] : memref<8x128xf32, #tpu.memory_space<vmem>>, vector<1x128xf32>
    %41 = vector.broadcast %40 : vector<1x128xf32> to vector<2x128xf32>
    %42 = arith.mulf %37, %41 : vector<2x128xf32>
    %c2_35 = arith.constant 2 : index
    %c0_36 = arith.constant 0 : index
    %43 = vector.load %arg3[%c2_35, %c0_36] : memref<8x128xf32, #tpu.memory_space<vmem>>, vector<1x128xf32>
    %44 = arith.mulf %39, %42 : vector<2x128xf32>
    %45 = vector.broadcast %43 : vector<1x128xf32> to vector<2x128xf32>
    %46 = arith.subf %45, %44 : vector<2x128xf32>
    %c0_37 = arith.constant 0 : index
    %c0_38 = arith.constant 0 : index
    %47 = vector.load %arg7[%c0_37, %c0_38] : memref<32x2xf32, #tpu.memory_space<vmem>>, vector<32x2xf32>
    %cst_39 = arith.constant dense<0.000000e+00> : vector<32x128xf32>
    %48 = tpu.matmul %47, %42, %cst_39 {dimension_numbers = #tpu.dot_dimension_numbers<[1], [0], [0], [1], [0, 0, 1, 1], [], []>} : vector<32x2xf32>, vector<2x128xf32>, vector<32x128xf32> -> vector<32x128xf32>
    %49 = arith.mulf %16, %48 : vector<32x128xf32>
    %cst_40 = arith.constant dense<0.000000e+00> : vector<32x128xf32>
    %50 = tpu.matmul %47, %46, %cst_40 {dimension_numbers = #tpu.dot_dimension_numbers<[1], [0], [0], [1], [0, 0, 1, 1], [], []>} : vector<32x2xf32>, vector<2x128xf32>, vector<32x128xf32> -> vector<32x128xf32>
    %51 = arith.addf %49, %50 : vector<32x128xf32>
    %cst_41 = arith.constant 2.000000e+01 : f32
    %52 = vector.broadcast %cst_41 : f32 to vector<32x128xf32>
    %53 = arith.minimumf %51, %52 : vector<32x128xf32>
    %54 = math.exp %53 : vector<32x128xf32>
    %cst_42 = arith.constant 1.000000e+00 : f32
    %55 = vector.broadcast %cst_42 : f32 to vector<32x128xf32>
    %56 = arith.addf %55, %54 : vector<32x128xf32>
    %cst_43 = arith.constant 1.000000e+00 : f32
    %57 = vector.broadcast %cst_43 : f32 to vector<32x128xf32>
    %58 = arith.addf %57, %54 : vector<32x128xf32>
    %59 = arith.mulf %56, %58 : vector<32x128xf32>
    %cst_44 = arith.constant 1.000000e+00 : f32
    %60 = vector.broadcast %cst_44 : f32 to vector<32x128xf32>
    %61 = arith.subf %59, %60 : vector<32x128xf32>
    %cst_45 = arith.constant 1.000000e+00 : f32
    %62 = vector.broadcast %cst_45 : f32 to vector<32x128xf32>
    %63 = arith.addf %59, %62 : vector<32x128xf32>
    %64 = tpu.reciprocal %63 {approx = true} : vector<32x128xf32> -> vector<32x128xf32>
    %65 = arith.mulf %61, %64 : vector<32x128xf32>
    %cst_46 = arith.constant 2.000000e+01 : f32
    %66 = vector.broadcast %cst_46 : f32 to vector<32x128xf32>
    %67 = arith.cmpf ogt, %51, %66 : vector<32x128xf32>
    %cst_47 = arith.constant 1.000000e+00 : f32
    %68 = vector.broadcast %cst_47 : f32 to vector<32x128xf32>
    %69 = arith.select %67, %68, %65 : vector<32x128xi1>, vector<32x128xf32>
    %70 = arith.mulf %51, %69 : vector<32x128xf32>
    %c0_48 = arith.constant 0 : index
    %c0_49 = arith.constant 0 : index
    %c0_50 = arith.constant 0 : index
    %71 = vector.load %arg8[%c0_48, %c0_49, %c0_50] : memref<1x32x128xf32, #tpu.memory_space<vmem>>, vector<1x32x128xf32>
    %72 = vector.shape_cast %71 : vector<1x32x128xf32> to vector<32x128xf32>
    %73 = vector.shape_cast %70 : vector<32x128xf32> to vector<1x32x128xf32>
    tpu.vector_store %arg8[%c0_48, %c0_49, %c0_50], %73 {strides = array<i32>} : memref<1x32x128xf32, #tpu.memory_space<vmem>>, vector<1x32x128xf32>,
    return
  }
  func.func @transform_0(%arg0: i32) -> (i32, i32, i32) {
    %c0_i32 = arith.constant 0 : i32
    %c0_i32_0 = arith.constant 0 : i32
    %c0_i32_1 = arith.constant 0 : i32
    return %arg0, %c0_i32, %c0_i32_0 : i32, i32, i32
  }
  func.func @transform_1(%arg0: i32) -> (i32, i32) {
    %c0_i32 = arith.constant 0 : i32
    %c0_i32_0 = arith.constant 0 : i32
    %c0_i32_1 = arith.constant 0 : i32
    return %c0_i32, %c0_i32_0 : i32, i32
  }
  func.func @transform_2(%arg0: i32) -> (i32, i32) {
    %c0_i32 = arith.constant 0 : i32
    %c0_i32_0 = arith.constant 0 : i32
    %c0_i32_1 = arith.constant 0 : i32
    return %c0_i32, %c0_i32_0 : i32, i32
  }
  func.func @transform_3(%arg0: i32) -> (i32, i32) {
    %c0_i32 = arith.constant 0 : i32
    %c0_i32_0 = arith.constant 0 : i32
    %c0_i32_1 = arith.constant 0 : i32
    return %c0_i32, %c0_i32_0 : i32, i32
  }
  func.func @transform_4(%arg0: i32) -> (i32, i32) {
    %c0_i32 = arith.constant 0 : i32
    %c0_i32_0 = arith.constant 0 : i32
    %c0_i32_1 = arith.constant 0 : i32
    return %c0_i32, %c0_i32_0 : i32, i32
  }
  func.func @transform_5(%arg0: i32) -> (i32, i32) {
    %c0_i32 = arith.constant 0 : i32
    %c0_i32_0 = arith.constant 0 : i32
    %c0_i32_1 = arith.constant 0 : i32
    return %c0_i32, %c0_i32_0 : i32, i32
  }
  func.func @transform_6(%arg0: i32) -> (i32, i32) {
    %c0_i32 = arith.constant 0 : i32
    %c0_i32_0 = arith.constant 0 : i32
    %c0_i32_1 = arith.constant 0 : i32
    return %c0_i32, %c0_i32_0 : i32, i32
  }
  func.func @transform_7(%arg0: i32) -> (i32, i32, i32) {
    %c0_i32 = arith.constant 0 : i32
    %c0_i32_0 = arith.constant 0 : i32
    %c0_i32_1 = arith.constant 0 : i32
    return %arg0, %c0_i32, %c0_i32_0 : i32, i32, i32
  }
}

</mosaic_0001>

<bundles_post_ra>
// kernel: tpu_custom_call.1
= control target key start
LH: loop header
LB: loop body
LE: loop exit
PB: predicated region body
PF: predicated region fallthrough
CT: control target
= control target key end

     0   :  { %12 = vsyncpa [#allocation3], 0  ;;  %s2074_s0 = inlined_call_operand.vmem [shape: bf16[1,36,128], index: 0, kind: input, shape index: {}]   ;;  %s2075_s1 = inlined_call_operand.hbm [shape: bf16[384,128], index: 1, kind: input, shape index: {}]   ;;  %s2076_s2 = inlined_call_operand.vmem [shape: f32[8,128], index: 2, kind: input, shape index: {}]   ;;  %s2077_s3 = inlined_call_operand.hbm [shape: f32[128,128], index: 3, kind: input, shape index: {}]   ;;  %s2078_s4 = inlined_call_operand.hbm [shape: f32[128,128], index: 4, kind: input, shape index: {}]   ;;  %s2079_s5 = inlined_call_operand.vmem [shape: f32[2,32], index: 5, kind: input, shape index: {}]   ;;  %s2080_s6 = inlined_call_operand.vmem [shape: f32[32,2], index: 6, kind: input, shape index: {}]   ;;  %s2081_s7 = inlined_call_operand.hbm [shape: f32[1,32,128], index: 7, kind: output, shape index: {}]  }
   0x1   :  { %13 = vsyncpa [#allocation6], 0 }
   0x2   :  { %14 = vsyncpa [#allocation4], 0  ;;  %s1771_s24 = smov [#allocation5]  }
   0x3   :  { %s36_s25 = sshll.u32 %s1771_s24, 4  ;;  %s37_s25 = int_to_ptr.vmem [resolvable:$true] %s36_s25 }
   0x4   :  { %s1693_s26 = scalar_lea.vmem %s37_s25, 2048  ;;  %p1698_p1 = scmp.lt.s32.totalorder %s37_s25, %s37_s25 }
   0x5   :  { %p1694_p0 = scmp.ne.s32.totalorder %s37_s25, %s1693_s26  ;;  %p1699_p2 = scmp.lt.s32.totalorder %s1693_s26, %s1693_s26 }
   0x7   :  { %p1700_p3 = por %p1699_p2, %p1698_p1 }
   0x9   :  { %p1701_p4 = pnand %p1700_p3, %p1694_p0 }
   0xb   :  { %1704 = shalt.err (!%p1701_p4)
}
   0xc   :  { %s1772_s27 = smov 128   ;;  %s1773_s28 = smov 8  }
   0xd   :  { %42 = dma.hbm_to_vmem [thread:$0]  %s2077_s3, 2048, %s37_s25, [#allocation6], %s1772_s27, %s1772_s27, %s1773_s28  }
   0xe   :  { %s1774_s8 = smov [#allocation2]  }
   0xf   :  { %s22_s9 = sshll.u32 %s1774_s8, 4  ;;  %s23_s9 = int_to_ptr.vmem [resolvable:$true] %s22_s9 }
  0x10   :  { %s1713_s10 = scalar_lea.vmem %s23_s9, 3072  ;;  %p1718_p6 = scmp.lt.s32.totalorder %s23_s9, %s23_s9 }
  0x11   :  { %p1714_p5 = scmp.ne.s32.totalorder %s23_s9, %s1713_s10  ;;  %p1719_p7 = scmp.lt.s32.totalorder %s1713_s10, %s1713_s10 }
  0x13   :  { %p1720_p8 = por %p1719_p7, %p1718_p6 }
  0x15   :  { %p1721_p9 = pnand %p1720_p8, %p1714_p5 }
  0x17   :  { %1724 = shalt.err (!%p1721_p9)
}
  0x18   :  { %s1775_s11 = smov 64   ;;  %s1776_s12 = smov 4  }
  0x19   :  { %28 = dma.hbm_to_vmem [thread:$0]  %s2075_s1, 3072, %s23_s9, [#allocation3], %s1775_s11, %s1775_s11, %s1776_s12  }
  0x1a   :  { %s1777_s15 = smov [#allocation7]  }
  0x1b   :  { %s48_s16 = sshll.u32 %s1777_s15, 4  ;;  %s49_s16 = int_to_ptr.vmem [resolvable:$true] %s48_s16 }
  0x1c   :  { %s1733_s3 = scalar_lea.vmem %s49_s16, 2048  ;;  %p1738_p11 = scmp.lt.s32.totalorder %s49_s16, %s49_s16 }
  0x1d   :  { %p1734_p10 = scmp.ne.s32.totalorder %s49_s16, %s1733_s3  ;;  %p1739_p12 = scmp.lt.s32.totalorder %s1733_s3, %s1733_s3 }
  0x1f   :  { %p1740_p13 = por %p1739_p12, %p1738_p11 }
  0x21   :  { %p1741_p0 = pnand %p1740_p13, %p1734_p10 }
  0x23   :  { %1744 = shalt.err (!%p1741_p0)
}
  0x24   :  { %54 = dma.hbm_to_vmem [thread:$0]  %s2078_s4, 2048, %s49_s16, [#allocation6], %s1772_s27, %s1772_s27, %s1773_s28  }
  0x25   :  { %1765 = dma.done.wait [#allocation3], 3072  }
  0x26   :  { %1766 = vsyncadd [#allocation3], 4294964224 }
  0x27   :  { %1767 = dma.done.wait [#allocation6], 4096  }
  0x28   :  { %1768 = vsyncadd [#allocation6], 4294963200  ;;  %v1637_v0 = vld [vmem:[#allocation2 + $0x78] sm:$0xff]   ;;  %v1639_v2 = vld [vmem:[#allocation2 + $0x70] sm:$0xff]   ;;  %vm120_vm0 = vcmask 1046528   ;;  %vm351_vm1 = vcmask 1045504  }
  0x29   :  { %v1638_v1 = vld [vmem:[#allocation2 + $0x38] sm:$0xff]   ;;  %1389 = vmatprep.subr.bf16.mxu0 %v1637_v0  ;;  %v1640_v3 = vld [vmem:[#allocation2 + $0x30] sm:$0xff]   ;;  %v1641_v4 = vld [vmem:[#allocation2 + $0x68] sm:$0xff]   ;;  %v1778_v44 = vmov 0.0   ;;  %vm1779_vm2 = vmmov 0   ;;  %vm470_vm3 = vcmask 261120  }
  0x2a   :  { %1409 = vmatprep.subr.bf16.mxu1 %v1638_v1  ;;  %1390 = vmatpush3.bf16.msra.mxu0 %v1637_v0  ;;  %v1642_v5 = vld [vmem:[#allocation2 + $0x28] sm:$0xff]   ;;  %v1643_v6 = vld [vmem:[#allocation2 + $0x60] sm:$0xff]   ;;  %v1645_v8 = vld [vmem:[#allocation2 + $0x58] sm:$0xff]   ;;  %vm954_vm4 = vcmask 15360   ;;  %vm967_vm5 = vcmask 1041408  }
  0x2b   :  { %1410 = vmatpush3.bf16.msra.mxu1 %v1638_v1  ;;  %1391 = vmatprep.subr.bf16.mxu0 %v1639_v2  ;;  %v1644_v7 = vld [vmem:[#allocation2 + $0x20] sm:$0xff]   ;;  %v1646_v9 = vld [vmem:[#allocation2 + $0x18] sm:$0xff]   ;;  %v1647_v10 = vld [vmem:[#allocation2 + $0x50] sm:$0xff]  }
  0x2c   :  { %1411 = vmatprep.subr.bf16.mxu1 %v1640_v3  ;;  %v1648_v11 = vld [vmem:[#allocation2 + $0x10] sm:$0xff]   ;;  %v70_v12 = vld [vmem:[%s2074_s0 + $0x4] sm:$0xf]  ;;  %v89_v13 = vld [vmem:[%s2074_s0] sm:$0xe] }
  0x2d   :  { %v1845_v14 = vld [vmem:[%s2074_s0 + $0x8] sm:$0xff]   ;;  %v69_v15 = vld [vmem:[%s2074_s0] sm:$0xf]  ;;  %v1222_v16 = vcombine.low %v89_v13, %v70_v12  ;;  %v1656_v22 = vld [vmem:[%s2074_s0 + $0x10] ss:$0 sps:$4 sm:$0x11]  }
  0x2e   :  { %1392 = vmatpush3.bf16.msra.mxu0 %v1639_v2  ;;  %v1233_v17 = vcombine.low %v69_v15, %v70_v12  ;;  %v122_v18 = vrot.slane %v1845_v14, 1  ;;  %v1649_v19 = vld [vmem:[#allocation2 + $0x48] sm:$0xff]   ;;  %v1651_v24 = vld [vmem:[#allocation2 + $0x40] sm:$0xff]   ;;  %v124_v26 = vrot.slane %v1656_v22, 1  ;;  %v1657_v28 = vld [vmem:[#allocation2 + $0xb8] sm:$0xff]   ;;  %v353_v30 = vrot.slane %v1845_v14, 2 }
  0x2f   :  { %1412 = vmatpush3.bf16.msra.mxu1 %v1640_v3  ;;  %1393 = vmatprep.subr.bf16.mxu0 %v1641_v4  ;;  %v121_v20 = vrot.slane %v1222_v16, 1  ;;  %v1650_v21 = vld [vmem:[#allocation2 + $0x8] sm:$0xff]   ;;  %v1652_v25 = vld [vmem:[#allocation2] sm:$0xff]   ;;  %v1658_v33 = vld [vmem:[#allocation2 + $0xb0] sm:$0xff]  }
  0x30   :  { %1413 = vmatprep.subr.bf16.mxu1 %v1642_v5  ;;  %1425 = vmatprep.mubr.bf16.mxu1 %v1233_v17  ;;  %v327_v27 = vld [vmem:[%s2074_s0] sm:$0xc]  ;;  %v125_v32 = vsel %vm120_vm0, %v122_v18, %v124_v26  ;;  %v1659_v35 = vld [vmem:[#allocation2 + $0xa8] sm:$0xff]   ;;  %v1661_v37 = vld [vmem:[#allocation2 + $0x98] sm:$0xff]  }
  0x31   :  { %v123_v23 = vsel %vm120_vm0, %v121_v20, %v122_v18  ;;  %v1242_v29 = vcombine.low %v327_v27, %v70_v12  ;;  %v1660_v36 = vld [vmem:[#allocation2 + $0xa0] sm:$0xff]   ;;  %v1662_v38 = vld [vmem:[#allocation2 + $0x90] sm:$0xff]   ;;  %v1663_v39 = vld [vmem:[#allocation2 + $0x88] sm:$0xff]  }
  0x32   :  { %1394 = vmatpush3.bf16.msra.mxu0 %v1641_v4  ;;  %1405 = vmatprep.mubr.bf16.mxu0 %v123_v23  ;;  %v1666_v40 = vld [vmem:[%s2074_s0 + $0x10] ss:$0 sps:$4 sm:$0x33]   ;;  %v1664_v41 = vld [vmem:[#allocation2 + $0x80] sm:$0xff]   ;;  %v1872_v45 = vld [vmem:[#allocation5 + $0x78] sm:$0xff] }
  0x33   :  { %1414 = vmatpush3.bf16.msra.mxu1 %v1642_v5  ;;  %1395 = vmatprep.subr.bf16.mxu0 %v1643_v6  ;;  %v352_v31 = vrot.slane %v1242_v29, 2  ;;  %v355_v42 = vrot.slane %v1666_v40, 2  ;;  %v1875_v46 = vld [vmem:[#allocation5 + $0x70] sm:$0xff]  ;;  %v1879_v47 = vld [vmem:[#allocation5 + $0x68] sm:$0xff]  ;;  %v1883_v48 = vld [vmem:[#allocation5 + $0x60] sm:$0xff] }
  0x34   :  { %1415 = vmatprep.subr.bf16.mxu1 %v1644_v7  ;;  %v1887_v49 = vld [vmem:[#allocation5 + $0x58] sm:$0xff]  ;;  %v1891_v50 = vld [vmem:[#allocation5 + $0x50] sm:$0xff]  ;;  %v1895_v51 = vld [vmem:[#allocation5 + $0x48] sm:$0xff] }
  0x35   :  { %v354_v34 = vsel %vm351_vm1, %v352_v31, %v353_v30  ;;  %v356_v43 = vsel %vm351_vm1, %v353_v30, %v355_v42  ;;  %v1899_v52 = vld [vmem:[#allocation5 + $0x40] sm:$0xff]  ;;  %v1903_v53 = vld [vmem:[#allocation5 + $0x38] sm:$0xff]  ;;  %v1907_v54 = vld [vmem:[#allocation5 + $0x30] sm:$0xff] }
  0x36   :  { %1396 = vmatpush3.bf16.msra.mxu0 %v1643_v6  ;;  %v1911_v55 = vld [vmem:[#allocation5 + $0x28] sm:$0xff]  ;;  %v1915_v56 = vld [vmem:[#allocation5 + $0x20] sm:$0xff]  ;;  %v1919_v57 = vld [vmem:[#allocation5 + $0x18] sm:$0xff] }
  0x37   :  { %1416 = vmatpush3.bf16.msra.mxu1 %v1644_v7  ;;  %1397 = vmatprep.subr.bf16.mxu0 %v1645_v8  ;;  %v1923_v58 = vld [vmem:[#allocation5 + $0x10] sm:$0xff]  ;;  %v1927_v59 = vld [vmem:[#allocation5 + $0x8] sm:$0xff]  ;;  %v1252_v12 = vld [vmem:[%s2076_s2] ss:$0 sm:$0xff] }
  0x38   :  { %1417 = vmatprep.subr.bf16.mxu1 %v1646_v9  ;;  %v618_v26 = vld [vmem:[#allocation5] sm:$0xff]  ;;  %v795_v30 = vld [vmem:[#allocation7 + $0x70] sm:$0xff]  ;;  %v794_v31 = vld [vmem:[#allocation7 + $0x68] sm:$0xff] }
  0x39   :  { %v787_v40 = vld [vmem:[#allocation7 + $0x30] sm:$0xff]  ;;  %v785_v42 = vld [vmem:[#allocation7 + $0x20] sm:$0xff] }
  0x3a   :  { %1398 = vmatpush3.bf16.msra.mxu0 %v1645_v8 }
  0x3b   :  { %1418 = vmatpush3.bf16.msra.mxu1 %v1646_v9  ;;  %1399 = vmatprep.subr.bf16.mxu0 %v1647_v10 }
  0x3c   :  { %1419 = vmatprep.subr.bf16.mxu1 %v1648_v11 }
  0x3e   :  { %1400 = vmatpush3.bf16.msra.mxu0 %v1647_v10 }
  0x3f   :  { %1420 = vmatpush3.bf16.msra.mxu1 %v1648_v11  ;;  %1401 = vmatprep.subr.bf16.mxu0 %v1649_v19 }
  0x40   :  { %1421 = vmatprep.subr.bf16.mxu1 %v1650_v21 }
  0x42   :  { %1402 = vmatpush3.bf16.msra.mxu0 %v1649_v19 }
  0x43   :  { %1422 = vmatpush3.bf16.msra.mxu1 %v1650_v21  ;;  %1403 = vmatprep.subr.bf16.mxu0 %v1651_v24  ;;  %v469_v21 = vld [vmem:[%s2079_s5] sm:$0x3] }
  0x44   :  { %1423 = vmatprep.subr.bf16.mxu1 %v1652_v25 }
  0x46   :  { %1404 = vmatpush3.bf16.msra.mxu0 %v1651_v24 }
  0x47   :  { %1424 = vmatpush3.bf16.msra.mxu1 %v1652_v25  ;;  %1429 = vmatprep.subr.bf16.mxu0 %v1657_v28 }
  0x48   :  { %1449 = vmatprep.subr.mxu1 %v1778_v44 }
  0x49   :  { %1406 = vmatmul.mubr.bf16.vlgmr.msra.gmra.mxu0 %v125_v32  ;;  %v793_v32 = vld [vmem:[#allocation7 + $0x60] sm:$0xff] }
  0x4a   :  { %1426 = vmatmul.mubr.bf16.vlgmr.msra.gmra.mxu1 %v1845_v14  ;;  %1430 = vmatpush3.bf16.msra.mxu0 %v1657_v28  ;;  %v796_v28 = vld [vmem:[#allocation7 + $0x78] sm:$0xff] }
  0x4b   :  { %1431 = vmatprep.subr.bf16.mxu0 %v1658_v33  ;;  %1445 = vmatprep.mubr.bf16.mxu0 %v354_v34 }
  0x4c   :  { %1457 = vmatprep.mubr.msk.f32.mxu1 %vm1779_vm2, %v1778_v44 }
  0x4e   :  { %1432 = vmatpush3.bf16.msra.mxu0 %v1658_v33 }
  0x4f   :  { %1433 = vmatprep.subr.bf16.mxu0 %v1659_v35 }
  0x52   :  { %1434 = vmatpush3.bf16.msra.mxu0 %v1659_v35  ;;  %v792_v35 = vld [vmem:[#allocation7 + $0x58] sm:$0xff] }
  0x53   :  { %1435 = vmatprep.subr.bf16.mxu0 %v1660_v36 }
  0x56   :  { %1436 = vmatpush3.bf16.msra.mxu0 %v1660_v36  ;;  %v791_v36 = vld [vmem:[#allocation7 + $0x50] sm:$0xff] }
  0x57   :  { %1437 = vmatprep.subr.bf16.mxu0 %v1661_v37 }
  0x5a   :  { %1438 = vmatpush3.bf16.msra.mxu0 %v1661_v37  ;;  %v790_v37 = vld [vmem:[#allocation7 + $0x48] sm:$0xff] }
  0x5b   :  { %1439 = vmatprep.subr.bf16.mxu0 %v1662_v38 }
  0x5e   :  { %1440 = vmatpush3.bf16.msra.mxu0 %v1662_v38  ;;  %v789_v38 = vld [vmem:[#allocation7 + $0x40] sm:$0xff] }
  0x5f   :  { %1441 = vmatprep.subr.bf16.mxu0 %v1663_v39 }
  0x62   :  { %1442 = vmatpush3.bf16.msra.mxu0 %v1663_v39  ;;  %v788_v39 = vld [vmem:[#allocation7 + $0x38] sm:$0xff] }
  0x63   :  { %1443 = vmatprep.subr.bf16.mxu0 %v1664_v41 }
  0x66   :  { %1444 = vmatpush3.bf16.msra.mxu0 %v1664_v41  ;;  %v786_v41 = vld [vmem:[#allocation7 + $0x28] sm:$0xff] }
  0x67   :  { %1506 = vmatprep.subr.mxu0 %v1778_v44 }
  0x69   :  { %1446 = vmatmul.mubr.bf16.vlgmr.msra.gmra.mxu0 %v356_v43  ;;  %v784_v43 = vld [vmem:[#allocation7 + $0x18] sm:$0xff] }
  0x6a   :  { %1538 = vmatprep.mubr.msk.f32.mxu0 %vm1779_vm2, %v1778_v44  ;;  %1507 = vmatpush3.msra.mxu0 %v1872_v45 }
  0x6b   :  { %1508 = vmatprep.subr.mxu0 %v1778_v44 }
  0x6c   :  { %1509 = vmatpush3.msra.mxu0 %v1875_v46 }
  0x6d   :  { %1510 = vmatprep.subr.mxu0 %v1778_v44 }
  0x6e   :  { %1511 = vmatpush3.msra.mxu0 %v1879_v47 }
  0x6f   :  { %1512 = vmatprep.subr.mxu0 %v1778_v44 }
  0x70   :  { %1513 = vmatpush3.msra.mxu0 %v1883_v48 }
  0x71   :  { %1514 = vmatprep.subr.mxu0 %v1778_v44 }
  0x72   :  { %1515 = vmatpush3.msra.mxu0 %v1887_v49 }
  0x73   :  { %1516 = vmatprep.subr.mxu0 %v1778_v44 }
  0x74   :  { %1517 = vmatpush3.msra.mxu0 %v1891_v50 }
  0x75   :  { %1518 = vmatprep.subr.mxu0 %v1778_v44 }
  0x76   :  { %1519 = vmatpush3.msra.mxu0 %v1895_v51 }
  0x77   :  { %1520 = vmatprep.subr.mxu0 %v1778_v44 }
  0x78   :  { %1521 = vmatpush3.msra.mxu0 %v1899_v52 }
  0x79   :  { %1522 = vmatprep.subr.mxu0 %v1778_v44 }
  0x7a   :  { %1523 = vmatpush3.msra.mxu0 %v1903_v53 }
  0x7b   :  { %1524 = vmatprep.subr.mxu0 %v1778_v44 }
  0x7c   :  { %1525 = vmatpush3.msra.mxu0 %v1907_v54 }
  0x7d   :  { %1526 = vmatprep.subr.mxu0 %v1778_v44 }
  0x7e   :  { %1527 = vmatpush3.msra.mxu0 %v1911_v55 }
  0x7f   :  { %1528 = vmatprep.subr.mxu0 %v1778_v44 }
  0x80   :  { %1529 = vmatpush3.msra.mxu0 %v1915_v56 }
  0x81   :  { %1530 = vmatprep.subr.mxu0 %v1778_v44 }
  0x82   :  { %1531 = vmatpush3.msra.mxu0 %v1919_v57 }
  0x83   :  { %1532 = vmatprep.subr.mxu0 %v1778_v44 }
  0x84   :  { %1533 = vmatpush3.msra.mxu0 %v1923_v58 }
  0x85   :  { %1534 = vmatprep.subr.mxu0 %v1778_v44 }
  0x86   :  { %1535 = vmatpush3.msra.mxu0 %v1927_v59 }
  0x87   :  { %1536 = vmatprep.subr.mxu0 %v1778_v44 }
  0x88   :  { %1537 = vmatpush3.msra.mxu0 %v618_v26 }
  0x89   :  { %1576 = vmatprep.subr.mxu0 %v1778_v44 }
 0x109   :  { %v1407_v60 = vpop.f32.mrf.mxu0 }
 0x10a   :  { %v1427_v61 = vpop.f32.mrf.mxu1 }
 0x10b   :  { %v210_v62 = vpop.f32.mrf.mxu0  ;;  %v321_v6 = vadd.f32 %v1427_v61, %v1407_v60  ;;  %v1255_v61 = vld [vmem:[%s2076_s2 + $0x1] ss:$0 sm:$0xff] }
 0x10c   :  { %v312_v63 = vpop.f32.mrf.mxu1 }
 0x10d   :  { %v1408_v0 = vpop.f32.mrf.mxu0  ;;  %v313_v14 = vadd.f32 %v312_v63, %v210_v62 }
 0x10e   :  { %v1428_v1 = vpop.f32.mrf.mxu1 }
 0x10f   :  { %v213_v2 = vpop.f32.mrf.mxu0  ;;  %v324_v7 = vadd.f32 %v1428_v1, %v1408_v0  ;;  %v1256_v0 = vld [vmem:[%s2076_s2 + $0x2] ss:$0 sm:$0xff]  ;;  %s1780_s2 = smov [#allocation8]  }
 0x110   :  { %v315_v4 = vpop.f32.mrf.mxu1 }
 0x111   :  { %v316_v9 = vadd.f32 %v315_v4, %v213_v2  ;;  %v951_v2 = vld [vmem:[%s2080_s6 + $0x8] sm:$0xff]  ;;  %v952_v4 = vld [vmem:[%s2080_s6 + $0x10] sm:$0xff] }
 0x129   :  { %v1447_v3 = vpop.f32.mrf.mxu0 }
 0x12a   :  { %v458_v10 = vadd.f32 %v1447_v3, %v321_v6  ;;  %v953_v6 = vld [vmem:[%s2080_s6 + $0x18] sm:$0xff] }
 0x12b   :  { %v441_v5 = vpop.f32.mrf.mxu0 }
 0x12c   :  { %v1937_v17 = vadd.f32 %v1252_v12, %v458_v10  ;;  %v456_v18 = vadd.f32 %v441_v5, %v313_v14 }
 0x12d   :  { %v1448_v8 = vpop.f32.mrf.mxu0 }
 0x12e   :  { %v459_v11 = vadd.f32 %v1448_v8, %v324_v7  ;;  %v1945_v20 = vadd.f32 %v1252_v12, %v456_v18  ;;  %v546_v23 = vmul.f32 %v1937_v17, %v1937_v17 }
 0x12f   :  { %v444_v13 = vpop.f32.mrf.mxu0 }
 0x130   :  { %v1935_v15 = vadd.f32 %v1252_v12, %v459_v11  ;;  %v457_v16 = vadd.f32 %v444_v13, %v316_v9  ;;  %v544_v25 = vmul.f32 %v1945_v20, %v1945_v20 }
 0x132   :  { %1450 = vmatpush3.msra.mxu1 %v1935_v15  ;;  %v1941_v19 = vadd.f32 %v1252_v12, %v457_v16  ;;  %v547_v22 = vmul.f32 %v1935_v15, %v1935_v15 }
 0x133   :  { %1451 = vmatprep.subr.mxu1 %v1778_v44 }
 0x134   :  { %1452 = vmatpush3.msra.mxu1 %v1937_v17  ;;  %v545_v24 = vmul.f32 %v1941_v19, %v1941_v19 }
 0x135   :  { %1453 = vmatprep.subr.mxu1 %v1778_v44 }
 0x136   :  { %1454 = vmatpush3.msra.mxu1 %v1941_v19 }
 0x137   :  { %1455 = vmatprep.subr.mxu1 %v1778_v44 }
 0x138   :  { %1456 = vmatpush3.msra.mxu1 %v1945_v20 }
 0x139   :  { %1458 = vmatmul.mubr.msk.f32.vlgmr.msra.gmra.mxu1 %vm470_vm3, %v469_v21  ;;  %1460 = vmatprep.subr.mxu1 %v1778_v44 }
 0x13a   :  { %1461 = vmatpush3.msra.mxu1 %v547_v22  ;;  %1468 = vmatprep.mubr.msk.f32.mxu1 %vm1779_vm2, %v1778_v44 }
 0x13b   :  { %1462 = vmatprep.subr.mxu1 %v1778_v44 }
 0x13c   :  { %1463 = vmatpush3.msra.mxu1 %v546_v23 }
 0x13d   :  { %1464 = vmatprep.subr.mxu1 %v1778_v44 }
 0x13e   :  { %1465 = vmatpush3.msra.mxu1 %v545_v24 }
 0x13f   :  { %1466 = vmatprep.subr.mxu1 %v1778_v44 }
 0x140   :  { %1467 = vmatpush3.msra.mxu1 %v544_v25 }
 0x141   :  { %1469 = vmatmul.mubr.msk.f32.vlgmr.msra.gmra.mxu1 %vm470_vm3, %v469_v21  ;;  %1471 = vmatprep.subr.mxu1 %v1778_v44 }
 0x142   :  { %1472 = vmatpush3.msra.mxu1 %v1872_v45  ;;  %1503 = vmatprep.mubr.msk.f32.mxu1 %vm1779_vm2, %v1778_v44  ;;  %v783_v45 = vld [vmem:[#allocation7 + $0x10] sm:$0xff] }
 0x143   :  { %1473 = vmatprep.subr.mxu1 %v1778_v44 }
 0x144   :  { %1474 = vmatpush3.msra.mxu1 %v1875_v46  ;;  %v782_v46 = vld [vmem:[#allocation7 + $0x8] sm:$0xff] }
 0x145   :  { %1475 = vmatprep.subr.mxu1 %v1778_v44 }
 0x146   :  { %1476 = vmatpush3.msra.mxu1 %v1879_v47  ;;  %v781_v47 = vld [vmem:[#allocation7] sm:$0xff] }
 0x147   :  { %1477 = vmatprep.subr.mxu1 %v1778_v44 }
 0x148   :  { %1478 = vmatpush3.msra.mxu1 %v1883_v48 }
 0x149   :  { %1479 = vmatprep.subr.mxu1 %v1778_v44 }
 0x14a   :  { %1480 = vmatpush3.msra.mxu1 %v1887_v49 }
 0x14b   :  { %1481 = vmatprep.subr.mxu1 %v1778_v44 }
 0x14c   :  { %1482 = vmatpush3.msra.mxu1 %v1891_v50 }
 0x14d   :  { %1483 = vmatprep.subr.mxu1 %v1778_v44 }
 0x14e   :  { %1484 = vmatpush3.msra.mxu1 %v1895_v51 }
 0x14f   :  { %1485 = vmatprep.subr.mxu1 %v1778_v44 }
 0x150   :  { %1486 = vmatpush3.msra.mxu1 %v1899_v52 }
 0x151   :  { %1487 = vmatprep.subr.mxu1 %v1778_v44 }
 0x152   :  { %1488 = vmatpush3.msra.mxu1 %v1903_v53 }
 0x153   :  { %1489 = vmatprep.subr.mxu1 %v1778_v44 }
 0x154   :  { %1490 = vmatpush3.msra.mxu1 %v1907_v54 }
 0x155   :  { %1491 = vmatprep.subr.mxu1 %v1778_v44 }
 0x156   :  { %1492 = vmatpush3.msra.mxu1 %v1911_v55 }
 0x157   :  { %1493 = vmatprep.subr.mxu1 %v1778_v44 }
 0x158   :  { %1494 = vmatpush3.msra.mxu1 %v1915_v56 }
 0x159   :  { %1495 = vmatprep.subr.mxu1 %v1778_v44 }
 0x15a   :  { %1496 = vmatpush3.msra.mxu1 %v1919_v57 }
 0x15b   :  { %1497 = vmatprep.subr.mxu1 %v1778_v44 }
 0x15c   :  { %1498 = vmatpush3.msra.mxu1 %v1923_v58 }
 0x15d   :  { %1499 = vmatprep.subr.mxu1 %v1778_v44 }
 0x15e   :  { %1500 = vmatpush3.msra.mxu1 %v1927_v59 }
 0x15f   :  { %1501 = vmatprep.subr.mxu1 %v1778_v44 }
 0x160   :  { %1502 = vmatpush3.msra.mxu1 %v618_v26 }
 0x161   :  { %1541 = vmatprep.subr.mxu1 %v1778_v44 }
 0x1f9   :  { %v540_v27 = vpop.f32.mrf.mxu1 }
 0x1fa   :  { %1504 = vmatmul.mubr.f32.vlgmr.msra.gmra.mxu1 %v540_v27 }
 0x1fb   :  { %v1459_v29 = vpop.f32.mrf.mxu1  ;;  %1542 = vmatpush3.msra.mxu1 %v796_v28  ;;  %1573 = vmatprep.mubr.msk.f32.mxu1 %vm1779_vm2, %v1778_v44 }
 0x1fc   :  { %1543 = vmatprep.subr.mxu1 %v1778_v44 }
 0x1fd   :  { %1544 = vmatpush3.msra.mxu1 %v795_v30 }
 0x1fe   :  { %1545 = vmatprep.subr.mxu1 %v1778_v44 }
 0x1ff   :  { %1546 = vmatpush3.msra.mxu1 %v794_v31 }
 0x200   :  { %1547 = vmatprep.subr.mxu1 %v1778_v44 }
 0x201   :  { %v614_v33 = vpop.f32.mrf.mxu1  ;;  %1548 = vmatpush3.msra.mxu1 %v793_v32 }
 0x202   :  { %1539 = vmatmul.mubr.f32.vlgmr.msra.gmra.mxu0 %v614_v33  ;;  %1549 = vmatprep.subr.mxu1 %v1778_v44 }
 0x203   :  { %v1470_v34 = vpop.f32.mrf.mxu1  ;;  %1577 = vmatpush3.msra.mxu0 %v796_v28  ;;  %1608 = vmatprep.mubr.msk.f32.mxu0 %vm1779_vm2, %v1778_v44 }
 0x204   :  { %1578 = vmatprep.subr.mxu0 %v1778_v44  ;;  %1550 = vmatpush3.msra.mxu1 %v792_v35 }
 0x205   :  { %1579 = vmatpush3.msra.mxu0 %v795_v30  ;;  %1551 = vmatprep.subr.mxu1 %v1778_v44 }
 0x206   :  { %1580 = vmatprep.subr.mxu0 %v1778_v44  ;;  %1552 = vmatpush3.msra.mxu1 %v791_v36 }
 0x207   :  { %1581 = vmatpush3.msra.mxu0 %v794_v31  ;;  %1553 = vmatprep.subr.mxu1 %v1778_v44 }
 0x208   :  { %1582 = vmatprep.subr.mxu0 %v1778_v44  ;;  %1554 = vmatpush3.msra.mxu1 %v790_v37 }
 0x209   :  { %1583 = vmatpush3.msra.mxu0 %v793_v32  ;;  %1555 = vmatprep.subr.mxu1 %v1778_v44 }
 0x20a   :  { %1584 = vmatprep.subr.mxu0 %v1778_v44  ;;  %1556 = vmatpush3.msra.mxu1 %v789_v38 }
 0x20b   :  { %1585 = vmatpush3.msra.mxu0 %v792_v35  ;;  %1557 = vmatprep.subr.mxu1 %v1778_v44 }
 0x20c   :  { %1586 = vmatprep.subr.mxu0 %v1778_v44  ;;  %1558 = vmatpush3.msra.mxu1 %v788_v39 }
 0x20d   :  { %1587 = vmatpush3.msra.mxu0 %v791_v36  ;;  %1559 = vmatprep.subr.mxu1 %v1778_v44 }
 0x20e   :  { %1588 = vmatprep.subr.mxu0 %v1778_v44  ;;  %1560 = vmatpush3.msra.mxu1 %v787_v40 }
 0x20f   :  { %1589 = vmatpush3.msra.mxu0 %v790_v37  ;;  %1561 = vmatprep.subr.mxu1 %v1778_v44 }
 0x210   :  { %1590 = vmatprep.subr.mxu0 %v1778_v44  ;;  %1562 = vmatpush3.msra.mxu1 %v786_v41 }
 0x211   :  { %1591 = vmatpush3.msra.mxu0 %v789_v38  ;;  %1563 = vmatprep.subr.mxu1 %v1778_v44 }
 0x212   :  { %1592 = vmatprep.subr.mxu0 %v1778_v44  ;;  %1564 = vmatpush3.msra.mxu1 %v785_v42 }
 0x213   :  { %1593 = vmatpush3.msra.mxu0 %v788_v39  ;;  %1565 = vmatprep.subr.mxu1 %v1778_v44 }
 0x214   :  { %1594 = vmatprep.subr.mxu0 %v1778_v44  ;;  %1566 = vmatpush3.msra.mxu1 %v784_v43 }
 0x215   :  { %1595 = vmatpush3.msra.mxu0 %v787_v40  ;;  %1567 = vmatprep.subr.mxu1 %v1778_v44 }
 0x216   :  { %1596 = vmatprep.subr.mxu0 %v1778_v44  ;;  %1568 = vmatpush3.msra.mxu1 %v783_v45 }
 0x217   :  { %1597 = vmatpush3.msra.mxu0 %v786_v41  ;;  %1569 = vmatprep.subr.mxu1 %v1778_v44 }
 0x218   :  { %1598 = vmatprep.subr.mxu0 %v1778_v44  ;;  %1570 = vmatpush3.msra.mxu1 %v782_v46 }
 0x219   :  { %1599 = vmatpush3.msra.mxu0 %v785_v42  ;;  %1571 = vmatprep.subr.mxu1 %v1778_v44 }
 0x21a   :  { %1600 = vmatprep.subr.mxu0 %v1778_v44  ;;  %1572 = vmatpush3.msra.mxu1 %v781_v47 }
 0x21b   :  { %1601 = vmatpush3.msra.mxu0 %v784_v43 }
 0x21c   :  { %1602 = vmatprep.subr.mxu0 %v1778_v44 }
 0x21d   :  { %1603 = vmatpush3.msra.mxu0 %v783_v45 }
 0x21e   :  { %1604 = vmatprep.subr.mxu0 %v1778_v44 }
 0x21f   :  { %1605 = vmatpush3.msra.mxu0 %v782_v46 }
 0x220   :  { %1606 = vmatprep.subr.mxu0 %v1778_v44  ;;  %v950_v44 = vld [vmem:[%s2080_s6] sm:$0xff]  ;;  %s1209_s6 = sshll.u32 %s1780_s2, 4  ;;  %s1210_s6 = int_to_ptr.vmem [resolvable:$true] %s1209_s6 }
 0x221   :  { %1607 = vmatpush3.msra.mxu0 %v781_v47  ;;  %s1745_s21 = scalar_lea.vmem %s1210_s6, 512  ;;  %p1750_p2 = scmp.lt.s32.totalorder %s1210_s6, %s1210_s6 }
 0x222   :  { %p1746_p1 = scmp.ne.s32.totalorder %s1210_s6, %s1745_s21  ;;  %p1751_p3 = scmp.lt.s32.totalorder %s1745_s21, %s1745_s21 }
 0x224   :  { %p1752_p4 = por %p1751_p3, %p1750_p2 }
 0x226   :  { %p1753_p5 = pnand %p1752_p4, %p1746_p1 }
 0x2ba   :  { %v700_v48 = vpop.f32.mrf.mxu1 }
 0x2bb   :  { %v704_v49 = vmul.f32 0.015625, %v700_v48 }
 0x2bc   :  { %v1505_v50 = vpop.f32.mrf.mxu1 }
 0x2bd   :  { %1609 = vmatmul.mubr.f32.vlgmr.msra.gmra.mxu0 %v704_v49  ;;  %v776_v52 = vmul.f32 %v704_v49, %v704_v49 }
 0x2c2   :  { %v771_v51 = vpop.f32.mrf.mxu0 }
 0x2c3   :  { %v775_v53 = vmul.f32 0.015625, %v771_v51 }
 0x2c4   :  { %v1540_v54 = vpop.f32.mrf.mxu0 }
 0x2c5   :  { %v777_v55 = vsub.f32 %v775_v53, %v776_v52 }
 0x2c7   :  { %v778_v56 = vmax.f32 %v777_v55, 0.0 }
 0x2c9   :  { %v779_v57 = vadd.f32 1e-05, %v778_v56 }
 0x2cb   :  { %1667 = vrsqrt.f32 %v779_v57 }
 0x2d8   :  { %v1668_v58 = vpop.eup %1667 }
 0x2d9   :  { %1574 = vmatmul.mubr.f32.vlgmr.msra.gmra.mxu1 %v1668_v58 }
 0x2da   :  { %1613 = vmatprep.mubr.msk.f32.mxu1 %vm954_vm4, %v950_v44 }
 0x37d   :  { %v933_v59 = vpop.f32.mrf.mxu0 }
 0x37f   :  { %v1610_v60 = vpop.f32.mrf.mxu0 }
 0x399   :  { %v863_v62 = vpop.f32.mrf.mxu1 }
 0x39a   :  { %v942_v63 = vmul.f32 %v1255_v61, %v863_v62 }
 0x39b   :  { %v1575_v1 = vpop.f32.mrf.mxu1 }
 0x39c   :  { %v944_v3 = vmul.f32 %v942_v63, %v933_v59  ;;  %1611 = vmatprep.subr.msk.mxu1 %vm967_vm5, %v942_v63 }
 0x39d   :  { %1612 = vmatpush3.msk.msra.mxu1 %vm967_vm5, %v942_v63 }
 0x39e   :  { %v949_v5 = vsub.f32 %v1256_v0, %v944_v3  ;;  %1614 = vmatmul.mubr.msk.f32.vlgmr.msra.gmra.mxu1 %vm954_vm4, %v951_v2 }
 0x39f   :  { %1616 = vmatprep.mubr.msk.f32.mxu1 %vm954_vm4, %v952_v4 }
 0x3a0   :  { %1619 = vmatprep.subr.msk.mxu1 %vm967_vm5, %v949_v5 }
 0x3a1   :  { %1620 = vmatpush3.msk.msra.mxu1 %vm967_vm5, %v949_v5 }
 0x3a2   :  { %1617 = vmatmul.mubr.msk.f32.gmra.mxu1 %vm954_vm4, %v953_v6 }
 0x3a3   :  { %1621 = vmatprep.mubr.msk.f32.mxu1 %vm954_vm4, %v950_v44 }
 0x3a6   :  { %1622 = vmatmul.mubr.msk.f32.vlgmr.msra.gmra.mxu1 %vm954_vm4, %v951_v2 }
 0x3a7   :  { %1624 = vmatprep.mubr.msk.f32.mxu1 %vm954_vm4, %v952_v4 }
 0x3aa   :  { %1625 = vmatmul.mubr.msk.f32.gmra.mxu1 %vm954_vm4, %v953_v6 }
 0x45e   :  { %v1615_v7 = vpop.f32.mrf.mxu1 }
 0x45f   :  { %v1057_v11 = vmul.f32 %v1615_v7, %v1941_v19 }
 0x460   :  { %v1037_v8 = vpop.f32.mrf.mxu1 }
 0x461   :  { %v1056_v13 = vmul.f32 %v1037_v8, %v1945_v20 }
 0x462   :  { %v1618_v9 = vpop.f32.mrf.mxu1 }
 0x463   :  { %v1059_v18 = vmul.f32 %v1618_v9, %v1935_v15 }
 0x464   :  { %v1047_v10 = vpop.f32.mrf.mxu1 }
 0x465   :  { %v1058_v27 = vmul.f32 %v1047_v10, %v1937_v17 }
 0x466   :  { %v1623_v12 = vpop.f32.mrf.mxu1 }
 0x467   :  { %v1149_v14 = vadd.f32 %v1623_v12, %v1057_v11 }
 0x468   :  { %v1129_v16 = vpop.f32.mrf.mxu1 }
 0x469   :  { %v1153_v21 = vmin.f32 %v1149_v14, 20.0  ;;  %v1148_v22 = vadd.f32 %v1129_v16, %v1056_v13  ;;  %vm1189_vm6 = vcmp.gt.f32.partialorder %v1149_v14, 20.0 }
 0x46a   :  { %v1626_v23 = vpop.f32.mrf.mxu1 }
 0x46b   :  { %v1158_v24 = vmul.f32 1.442695, %v1153_v21  ;;  %v1152_v25 = vmin.f32 %v1148_v22, 20.0  ;;  %v1151_v26 = vadd.f32 %v1626_v23, %v1059_v18  ;;  %vm1188_vm7 = vcmp.gt.f32.partialorder %v1148_v22, 20.0 }
 0x46c   :  { %v1139_v28 = vpop.f32.mrf.mxu1 }
 0x46d   :  { %1669 = vpow2.f32 %v1158_v24  ;;  %v1156_v29 = vmul.f32 1.442695, %v1152_v25  ;;  %v1155_v30 = vmin.f32 %v1151_v26, 20.0  ;;  %v1150_v19 = vadd.f32 %v1139_v28, %v1058_v27 }
 0x46e   :  { %vm1191_vm8 = vcmp.gt.f32.partialorder %v1151_v26, 20.0 }
 0x46f   :  { %1671 = vpow2.f32 %v1156_v29  ;;  %v1162_v31 = vmul.f32 1.442695, %v1155_v30  ;;  %v1154_v20 = vmin.f32 %v1150_v19, 20.0  ;;  %vm1190_vm9 = vcmp.gt.f32.partialorder %v1150_v19, 20.0 }
 0x471   :  { %1673 = vpow2.f32 %v1162_v31  ;;  %v1160_v32 = vmul.f32 1.442695, %v1154_v20 }
 0x473   :  { %1675 = vpow2.f32 %v1160_v32 }
 0x47a   :  { %v1670_v15 = vpop.eup %1669 }
 0x47b   :  { %v1165_v33 = vadd.f32 1.0, %v1670_v15 }
 0x47c   :  { %v1672_v34 = vpop.eup %1671 }
 0x47d   :  { %v1169_v35 = vmul.f32 %v1165_v33, %v1165_v33  ;;  %v1164_v36 = vadd.f32 1.0, %v1672_v34 }
 0x47e   :  { %v1674_v37 = vpop.eup %1673 }
 0x47f   :  { %v1177_v38 = vadd.f32 1.0, %v1169_v35  ;;  %v1168_v39 = vmul.f32 %v1164_v36, %v1164_v36  ;;  %v1167_v17 = vadd.f32 1.0, %v1674_v37  ;;  %v1268_v48 = vadd.f32 -1.0, %v1169_v35 }
 0x480   :  { %v1676_v40 = vpop.eup %1675 }
 0x481   :  { %1677 = vrcp.f32 %v1177_v38  ;;  %v1176_v41 = vadd.f32 1.0, %v1168_v39  ;;  %v1171_v42 = vmul.f32 %v1167_v17, %v1167_v17  ;;  %v1166_v43 = vadd.f32 1.0, %v1676_v40 }
 0x482   :  { %v1267_v51 = vadd.f32 -1.0, %v1168_v39 }
 0x483   :  { %1679 = vrcp.f32 %v1176_v41  ;;  %v1179_v45 = vadd.f32 1.0, %v1171_v42  ;;  %v1170_v46 = vmul.f32 %v1166_v43, %v1166_v43  ;;  %v1270_v55 = vadd.f32 -1.0, %v1171_v42 }
 0x485   :  { %1681 = vrcp.f32 %v1179_v45  ;;  %v1178_v47 = vadd.f32 1.0, %v1170_v46  ;;  %v1269_v60 = vadd.f32 -1.0, %v1170_v46 }
 0x487   :  { %1683 = vrcp.f32 %v1178_v47 }
 0x48e   :  { %v1678_v49 = vpop.eup %1677 }
 0x48f   :  { %v1185_v50 = vmul.f32 %v1678_v49, %v1268_v48 }
 0x490   :  { %v1680_v52 = vpop.eup %1679 }
 0x491   :  { %v1193_v53 = vsel %vm1189_vm6, 1.0, %v1185_v50  ;;  %v1184_v54 = vmul.f32 %v1680_v52, %v1267_v51 }
 0x492   :  { %v1682_v56 = vpop.eup %1681  ;;  %v1197_v57 = vmul.f32 %v1193_v53, %v1149_v14 }
 0x493   :  { %v1192_v58 = vsel %vm1188_vm7, 1.0, %v1184_v54  ;;  %v1187_v44 = vmul.f32 %v1682_v56, %v1270_v55 }
 0x494   :  { %1201 = vst [vmem:[#allocation8 + $0x8] sm:$0xff] %v1197_v57  ;;  %v1196_v59 = vmul.f32 %v1192_v58, %v1148_v22  ;;  %v1684_v61 = vpop.eup %1683 }
 0x495   :  { %v1195_v62 = vsel %vm1191_vm8, 1.0, %v1187_v44  ;;  %v1186_v0 = vmul.f32 %v1684_v61, %v1269_v60 }
 0x496   :  { %1200 = vst [vmem:[#allocation8] sm:$0xff] %v1196_v59  ;;  %v1199_v63 = vmul.f32 %v1195_v62, %v1151_v26 }
 0x497   :  { %v1194_v1 = vsel %vm1190_vm9, 1.0, %v1186_v0 }
 0x498   :  { %1203 = vst [vmem:[#allocation8 + $0x18] sm:$0xff] %v1199_v63  ;;  %v1198_v2 = vmul.f32 %v1194_v1, %v1150_v19 }
 0x49a   :  { %1202 = vst [vmem:[#allocation8 + $0x10] sm:$0xff] %v1198_v2 }
 0x49b   :  { %1756 = shalt.err (!%p1753_p5)
}
 0x49c   :  { %1215 = dma.vmem_to_hbm [thread:$0]  %s1210_s6, 512, %s2081_s7, [#allocation4], %s1772_s27, %s1772_s27, %s1773_s28  }
 0x49d   :  { %1769 = dma.done.wait [#allocation4], 512  }
 0x49e   :  { %1770 = vsyncadd [#allocation4], 4294966784 }
 0x49f   :  { %1219 = vsyncpa [#allocation3], 1 }
 0x4a0   :  { %1220 = vsyncpa [#allocation6], 1 }
 0x4a1   :  { %1221 = vsyncpa [#allocation4], 1 }

</bundles_post_ra>
